<compile_context>
chip_gen: v7x
topology: tpu7x:2x2x1
jax: 0.10.0
libtpu: 0.0.40
codegen_flags: <defaults>
</compile_context>

<pallas_src>
import jax
import jax.numpy as jnp
from jax.experimental import pallas as pl
from jax.experimental.pallas import tpu as pltpu

_LANES = 128


def _learner_kernel(theta_ref, dc_ref, out_ref):
    # theta = (w01, w10, b0, b1): scalars in SMEM via scalar prefetch.
    w01 = theta_ref[0]
    w10 = theta_ref[1]
    b0 = theta_ref[2]
    b1 = theta_ref[3]

    dc = dc_ref[...]                                   # (tr, 128) f32, lane-dense

    # One contiguous (tr, 256) stripe per grid step; both stores are full,
    # 128-lane-aligned, unmasked.  Kernel is HBM-bound (~4 flops / 12 bytes),
    # so no further in-kernel micro-optimization is worthwhile.
    out_ref[:, :_LANES] = (dc * w01 + b0).astype(out_ref.dtype)   # logit[:, 0]
    out_ref[:, _LANES:] = (dc * w10 + b1).astype(out_ref.dtype)   # logit[:, 1]


def _pick_tile(rows, tile_rows):
    """Tile rows: a multiple of 8, and small enough that the grid has >= 2
    blocks when rows >= 16 (lets 'parallel' use both TensorCores on v7x)."""
    tr = max(8, (min(tile_rows, rows) // 8) * 8)
    if rows >= 16:
        half = ((pl.cdiv(rows, 2) + 7) // 8) * 8
        tr = min(tr, half)
    return tr


def _learner_pallas_slab(theta, dc_arr, tile_rows, out_dtype):
    """Run the kernel; return the lane-dense (rows, 256) slab where
       slab[:, :128].reshape(-1)[:n] == dc * w01 + b0   (logit[:, 0])
       slab[:, 128:].reshape(-1)[:n] == dc * w10 + b1   (logit[:, 1])
    """
    n = dc_arr.shape[0]
    rows = pl.cdiv(n, _LANES)

    # Pack into (rows, 128).  If n is lane-aligned this is a free bitcast
    # reshape (no pad copy); otherwise we pad at most 127 elements.
    # TODO(synk): for unaligned n the pad is still one extra read+write of dc;
    # CompilerParams(allow_input_fusion=...) could fuse it into the operand.
    pad = rows * _LANES - n
    if pad:
        dc_arr = jnp.pad(dc_arr, (0, pad))
    dc2d = dc_arr.reshape(rows, _LANES)

    tr = _pick_tile(rows, tile_rows)
    grid = (pl.cdiv(rows, tr),)        # partial boundary block masked by Pallas

    grid_spec = pltpu.PrefetchScalarGridSpec(
        num_scalar_prefetch=1,                              # theta -> SMEM
        grid=grid,
        in_specs=[pl.BlockSpec((tr, _LANES), lambda i, theta_ref: (i, 0))],
        out_specs=pl.BlockSpec((tr, 2 * _LANES), lambda i, theta_ref: (i, 0)),
    )

    return pl.pallas_call(
        _learner_kernel,
        out_shape=jax.ShapeDtypeStruct((rows, 2 * _LANES), out_dtype),
        grid_spec=grid_spec,
        compiler_params=pltpu.CompilerParams(
            dimension_semantics=("parallel",),   # rows axis: embarrassingly parallel
        ),
    )(theta, dc2d)


def learner_forward_slab(theta, dc, *, tile_rows=1024, out_dtype=jnp.float32):
    """Fast-path API: returns the (rows, 256) slab directly (no (N,2) interleave).

    Perf-critical consumers should use this and read logit0/logit1 planes from
    the slab; it avoids a full extra HBM pass over the outputs.
    """
    theta = jnp.asarray(theta, dtype=jnp.float32)
    dc_arr = jnp.asarray(dc, dtype=jnp.float32).reshape(-1)
    return _learner_pallas_slab(theta, dc_arr, tile_rows, out_dtype)


def learner_forward(theta, a_past, dc, *, tile_rows=1024, min_pallas_elems=100_000,
                    out_dtype=jnp.float32):
    """JAX/Pallas equivalent of Learner.forward.

    theta : (4,) f32 parameter vector (w01, w10, b0, b1)
    a_past: used only for the scalar-vs-batched dispatch (as in PyTorch)
    dc    : scalar or (N,) observation
    Returns (2,) in the scalar branch, (N, 2) otherwise (PyTorch layout).
    """
    theta = jnp.asarray(theta, dtype=jnp.float32)
    w01, w10, b0, b1 = theta[0], theta[1], theta[2], theta[3]

    # Match the PyTorch reference's dispatch exactly: only a Python int takes
    # the scalar branch (0-d numpy/JAX ints fall through to the batched path,
    # mirroring the reference's `else` branch).
    if isinstance(a_past, int):
        d = jnp.asarray(dc, dtype=jnp.float32).reshape(())
        return jnp.stack([w01 * d + b0, w10 * d + b1]).astype(out_dtype)

    dc_arr = jnp.asarray(dc, dtype=jnp.float32).reshape(-1)
    n = dc_arr.shape[0]

    if n < min_pallas_elems:
        # Small batch: kernel launch + wrapper passes dwarf 4 flops/element;
        # plain fused XLA is strictly faster in this regime.
        return jnp.stack([dc_arr * w01 + b0, dc_arr * w10 + b1],
                         axis=-1).astype(out_dtype)

    slab = _learner_pallas_slab(theta, dc_arr, tile_rows, out_dtype)
    # Single fused epilogue producing the PyTorch (N, 2) layout.  This is the
    # one remaining extra HBM pass; consumers that can work with the planar
    # slab should call learner_forward_slab() and skip it.
    logit0 = slab[:, :_LANES].reshape(-1)[:n]
    logit1 = slab[:, _LANES:].reshape(-1)[:n]
    return jnp.stack([logit0, logit1], axis=-1)


if __name__ == "__main__":
    key = jax.random.PRNGKey(0)
    k_theta, k_dc = jax.random.split(key)

    # Deterministic "parameters" (mirrors nn.Parameter(torch.randn(4)))
    theta = jax.random.normal(k_theta, (4,), dtype=jnp.float32)
    w01, w10, b0, b1 = theta

    # --- Batched case through the Pallas path (N not a multiple of 128) ----
    seq = 4100
    dc = jax.random.normal(k_dc, (seq,), dtype=jnp.float32)
    a_past = jnp.zeros((seq,), dtype=jnp.int32)
    ref = jnp.stack([dc * w01 + b0, dc * w10 + b1], axis=-1)

    # Default tile (grid auto-capped to >= 2 blocks), force the Pallas path.
    logits = jax.block_until_ready(
        learner_forward(theta, a_past, dc, min_pallas_elems=1))
    assert logits.shape == (seq, 2)
    assert jnp.allclose(logits, ref, atol=1e-5, rtol=1e-5)

    # Small tile: multi-block grid + partial boundary block.
    logits_t = jax.block_until_ready(
        learner_forward(theta, a_past, dc, tile_rows=8, min_pallas_elems=1))
    assert logits_t.shape == (seq, 2)
    assert jnp.allclose(logits_t, ref, atol=1e-5, rtol=1e-5)

    # Lane-aligned N: no padding copy at all in the wrapper.
    seq2 = 2048
    dc2 = jax.random.normal(k_dc, (seq2,), dtype=jnp.float32)
    ref2 = jnp.stack([dc2 * w01 + b0, dc2 * w10 + b1], axis=-1)
    logits2 = jax.block_until_ready(
        learner_forward(theta, jnp.zeros((seq2,), jnp.int32), dc2,
                        min_pallas_elems=1))
    assert logits2.shape == (seq2, 2)
    assert jnp.allclose(logits2, ref2, atol=1e-5, rtol=1e-5)

    # Slab fast path: no (N, 2) interleave pass.
    slab = jax.block_until_ready(learner_forward_slab(theta, dc))
    s0 = slab[:, :_LANES].reshape(-1)[:seq]
    s1 = slab[:, _LANES:].reshape(-1)[:seq]
    assert jnp.allclose(jnp.stack([s0, s1], axis=-1), ref, atol=1e-5, rtol=1e-5)

    # --- Tiny batch: plain-JAX bypass (default threshold) -------------------
    seq_small = 8
    dc_small = jax.random.normal(k_dc, (seq_small,), dtype=jnp.float32)
    a_past_small = jnp.zeros((seq_small,), dtype=jnp.int32)
    logits_small = jax.block_until_ready(
        learner_forward(theta, a_past_small, dc_small))
    ref_small = jnp.stack([dc_small * w01 + b0, dc_small * w10 + b1], axis=-1)
    assert logits_small.shape == (seq_small, 2)
    assert jnp.allclose(logits_small, ref_small, atol=1e-5, rtol=1e-5)

    # --- Scalar branch: a_past is a Python int -> (2,) logits ---------------
    logit_s = jax.block_until_ready(learner_forward(theta, 0, 0.5))
    ref_s = jnp.array([0.5 * w01 + b0, 0.5 * w10 + b1], dtype=jnp.float32)
    assert logit_s.shape == (2,)
    assert jnp.allclose(logit_s, ref_s, atol=1e-5, rtol=1e-5)

    print("KERNEL_OK")
</pallas_src>

<mosaic_0001>
module attributes {stable_mosaic.version = 11 : i64} {
  func.func @_learner_kernel(%arg0: i32, %arg1: memref<4xf32, #tpu.memory_space<smem>>, %arg2: memref<24x128xf32, #tpu.memory_space<vmem>>, %arg3: memref<24x256xf32, #tpu.memory_space<vmem>>) attributes {dimension_semantics = [#tpu.dimension_semantics<parallel>], iteration_bounds = array<i64: 2>, scalar_prefetch = 1 : i64, scratch_operands = 0 : i64, tpu.core_type = #tpu.core_type<tc>, window_params = [{transform_indices = @transform_0, window_bounds = array<i64: 24, 128>}, {transform_indices = @transform_1, window_bounds = array<i64: 24, 256>}]} {
    %c0 = arith.constant 0 : index
    %0 = memref.load %arg1[%c0] : memref<4xf32, #tpu.memory_space<smem>>
    %c1 = arith.constant 1 : index
    %1 = memref.load %arg1[%c1] : memref<4xf32, #tpu.memory_space<smem>>
    %c2 = arith.constant 2 : index
    %2 = memref.load %arg1[%c2] : memref<4xf32, #tpu.memory_space<smem>>
    %c3 = arith.constant 3 : index
    %3 = memref.load %arg1[%c3] : memref<4xf32, #tpu.memory_space<smem>>
    %c0_0 = arith.constant 0 : index
    %c0_1 = arith.constant 0 : index
    %4 = vector.load %arg2[%c0_0, %c0_1] : memref<24x128xf32, #tpu.memory_space<vmem>>, vector<24x128xf32>
    %5 = vector.broadcast %0 : f32 to vector<24x128xf32>
    %6 = arith.mulf %4, %5 : vector<24x128xf32>
    %7 = vector.broadcast %2 : f32 to vector<24x128xf32>
    %8 = arith.addf %6, %7 : vector<24x128xf32>
    %c0_2 = arith.constant 0 : index
    %c0_3 = arith.constant 0 : index
    %9 = vector.load %arg3[%c0_2, %c0_3] : memref<24x256xf32, #tpu.memory_space<vmem>>, vector<24x128xf32>
    tpu.vector_store %arg3[%c0_2, %c0_3], %8 {strides = array<i32>} : memref<24x256xf32, #tpu.memory_space<vmem>>, vector<24x128xf32>,
    %10 = vector.broadcast %1 : f32 to vector<24x128xf32>
    %11 = arith.mulf %4, %10 : vector<24x128xf32>
    %12 = vector.broadcast %3 : f32 to vector<24x128xf32>
    %13 = arith.addf %11, %12 : vector<24x128xf32>
    %c0_4 = arith.constant 0 : index
    %c128 = arith.constant 128 : index
    %14 = vector.load %arg3[%c0_4, %c128] : memref<24x256xf32, #tpu.memory_space<vmem>>, vector<24x128xf32>
    tpu.vector_store %arg3[%c0_4, %c128], %13 {strides = array<i32>} : memref<24x256xf32, #tpu.memory_space<vmem>>, vector<24x128xf32>,
    return
  }
  func.func @transform_0(%arg0: i32, %arg1: memref<4xf32, #tpu.memory_space<smem>>) -> (i32, i32) {
    %c0_i32 = arith.constant 0 : i32
    %c0_i32_0 = arith.constant 0 : i32
    return %arg0, %c0_i32 : i32, i32
  }
  func.func @transform_1(%arg0: i32, %arg1: memref<4xf32, #tpu.memory_space<smem>>) -> (i32, i32) {
    %c0_i32 = arith.constant 0 : i32
    %c0_i32_0 = arith.constant 0 : i32
    return %arg0, %c0_i32 : i32, i32
  }
}

</mosaic_0001>

<bundles_post_ra>
// kernel: tpu_custom_call.1
= control target key start
LH: loop header
LB: loop body
LE: loop exit
PB: predicated region body
PF: predicated region fallthrough
CT: control target
= control target key end

     0   :  { %s667_s0 = inlined_call_operand.hbm [shape: f32[4], index: 0, kind: input, shape index: {}]   ;;  %s668_s1 = inlined_call_operand.hbm [shape: f32[33,128], index: 1, kind: input, shape index: {}]   ;;  %s669_s2 = inlined_call_operand.hbm [shape: f32[33,256], index: 2, kind: output, shape index: {}]  }
   0x1   :  { %s354_s11 = scalar_lea.hbm %s667_s0, 16 }
   0x2   :  { %p355_p0 = scmp.ne.s32.totalorder %s667_s0, %s354_s11  ;;  %p358_p1 = scmp.lt.u32.totalorder %s354_s11, %s667_s0 }
   0x4   :  { %p360_p2 = pnand %p358_p1, %p355_p0 }
   0x6   :  { %363 = shalt.err (!%p360_p2)  }
   0x7   :  { %s462_s16 = smov [#allocation3]  }
   0x8   :  { %8 = dma.hbm_to_smem %s667_s0, 16, %s462_s16, [#allocation2] }
   0x9   :  { %436 = dma.done.wait [#allocation2], 16 }
   0xa   :  { %437 = vsyncadd [#allocation2], 4294967280 }
   0xb   :  { %10 = sfence }
   0xc   :  { %11 = vsyncpa [#allocation5], 0 }
   0xd   :  { %13 = vsyncpa [#allocation5 + $0x1], 0 }
   0xe   :  { %14 = vsyncpa [#allocation6], 0 }
   0xf   :  { %16 = vsyncpa [#allocation6 + $0x1], 0  ;;  %s496_s19 = smov 0   ;;  %s498_s20 = smov 0  }
  0x10   :  { %s500_s21 = smov 0   ;;  %s502_s22 = smov 0  }
  0x11 LB: > { %s517_s0 = sadd.s32 4294967295, %s460_s22   ;;  %s281_s23 = sadd.s32 4294967294, %s460_s22   ;;  %s460_s22 = sphi %s502_s22, %s679_s22   ;;  %s456_s21 = sphi %s500_s21, %s678_s21   ;;  %s452_s20 = sphi %s498_s20, %s677_s20   ;;  %s448_s19 = sphi %s496_s19, %s676_s19  }
  0x12   : > { %s521_s24 = sadd.s32 1, %s460_s22   ;;  %s29_s25 = sadd.s32 1, %s456_s21 }
  0x13   : > { %s26_s26 = ssub.s32 %s460_s22, %s521_s24  ;;  %p36_p3 = scmp.ne.s32.totalorder %s456_s21, %s452_s20 }
  0x14   : > { %p27_p4 = scmp.eq.s32.totalorder %s26_s26, 0  ;;  %p37_p5 = scmp.eq.s32.totalorder %s460_s22, 0 }
  0x15   : > { %p42_p6 = scmp.ne.s32.totalorder %s452_s20, %s448_s19  ;;  %p43_p7 = scmp.eq.s32.totalorder %s517_s0, 0 }
  0x16   : > { %s533_s27 = scalar_select %p27_p4, %s456_s21, %s29_s25  }
  0x17   : > { %p38_p8 = por %p37_p5, %p36_p3  ;;  %p535_p9 = por %p43_p7, %p42_p6 }
  0x18   : > { %p66_p10 = scmp.eq.s32.totalorder %s517_s0, 1  ;;  %p72_p11 = scmp.eq.s32.totalorder %s281_s23, 1 }
  0x19   : > { %p670_p0 = scmp.ge.s32.totalorder %s460_s22, 2 }
  0x1a   : > { %p540_p12 = por %p66_p10, %p36_p3  ;;  %p544_p13 = por %p72_p11, %p42_p6 }
  0x1b   : > { %88 = sbr.rel (%p670_p0) target bundleno = 69 (0x45), region = 16 }
  0x1c   : > { %s673_s30 = scalar_select %p544_p13, 1, 0 }
  0x22   : > { %91 = sbr.rel (!%p38_p8) target bundleno = 69 (0x45), region = 20  ;;  %s92_s3 = sand.u32 (%p38_p8), 1, %s456_s21  }
  0x23   : > { %s97_s4 = smul.u32 (%p38_p8), 3, %s460_s22  ;;  %s556_s9 = scalar_lea.sflag (%p38_p8), [#allocation5], %s92_s3 }
  0x24   : > { %s307_s5 = smul.u32 (%p38_p8), 24, %s92_s3 }
  0x25   : > { %s98_s6 = ssub.s32 (%p38_p8), 5, %s97_s4 }
  0x26   : > { %p99_p1 = scmp.lt.s32.totalorder (%p38_p8), %s98_s6, 3  ;;  %s96_s10 = scalar_lea.vmem (%p38_p8), [#allocation4], %s307_s5 }
  0x29   : > { %s681_s6 = smov (!%p99_p1, %s98_s6), 3 }
  0x2a   : > { %s553_s7 = sshll.u32 %s681_s6, 7 }
  0x2b   : > { %s103_s8 = ssub.s32 384, %s553_s7 }
  0x2c   : > { %104 = vsyncadd %s556_s9, %s103_s8  ;;  %p285_p2 = scmp.ne.s32.totalorder %s553_s7, 0  ;;  %s302_s11 = smul.u32 384, %s460_s22 }
  0x2d   : > { %s109_s12 = sshll.u32 %s96_s10, 4  ;;  %s368_s23 = scalar_lea.hbm %s668_s1, 640  ;;  %s566_s12 = int_to_ptr.vmem [resolvable:$true] %s109_s12 }
  0x2e   : > { %s564_s15 = scalar_lea.hbm %s668_s1, %s302_s11 }
  0x2f   : > { %s364_s16 = scalar_lea.hbm %s564_s15, %s553_s7  ;;  %p369_p6 = scmp.lt.u32.totalorder %s564_s15, %s668_s1 }
  0x30   : > { %p365_p3 = scmp.ne.s32.totalorder %s564_s15, %s364_s16  ;;  %p370_p7 = scmp.lt.u32.totalorder %s368_s23, %s364_s16 }
  0x31   : > { %p372_p10 = scmp.lt.u32.totalorder %s364_s16, %s564_s15 }
  0x32   : > { %p366_p4 = pnand %p365_p3, %p285_p2  ;;  %p371_p8 = por %p370_p7, %p369_p6 }
  0x34   : > { %p367_p5 = pneg %p366_p4  ;;  %p373_p11 = por %p372_p10, %p371_p8 }
  0x36   : > { %p374_p1 = pnand %p373_p11, %p367_p5 }
  0x38   : > { %377 = shalt.err (!%p374_p1)
}
  0x39   : > { %s378_s3 = scalar_lea.vmem %s566_s12, %s553_s7  ;;  %s463_s4 = smov [#allocation4]  }
  0x3a   : > { %p379_p3 = scmp.ne.s32.totalorder %s566_s12, %s378_s3  ;;  %s382_s5 = sshll.u32 %s463_s4, 4  ;;  %s383_s5 = int_to_ptr.vmem [resolvable:$false] %s382_s5 }
  0x3b   : > { %s384_s6 = scalar_lea.vmem %s383_s5, 768  ;;  %p385_p13 = scmp.lt.s32.totalorder %s566_s12, %s383_s5 }
  0x3c   : > { %p380_p4 = pnand %p379_p3, %p285_p2  ;;  %p386_p6 = scmp.lt.s32.totalorder %s384_s6, %s378_s3 }
  0x3e   : > { %p381_p0 = pneg %p380_p4  ;;  %p387_p7 = por %p386_p6, %p385_p13 }
  0x40   : > { %p388_p8 = pnand %p387_p7, %p381_p0 }
  0x42   : > { %391 = shalt.err (!%p388_p8)
}
  0x43   : > { %s464_s8 = smov 128   ;;  %s465_s10 = smov 8  }
  0x44   : > { %115 = dma.hbm_to_vmem [thread:$0]  (%p285_p2), %s564_s15, %s553_s7, %s566_s12, %s556_s9, %s464_s8, %s464_s8, %s465_s10  }
  0x45 PF: > { %p289_p5 = scmp.ge.s32.totalorder %s460_s22, 1  ;;  %p117_p10 = scmp.lt.s32.totalorder %s460_s22, 3 }
  0x47   : > { %p118_p11 = pnand %p289_p5, %p117_p10 }
  0x48   : > { %s596_s11 = sand.u32 (!%p118_p11), 1, %s452_s20  }
  0x49   : > { %121 = sbr.rel (%p118_p11) target bundleno = 123 (0x7b), region = 24  ;;  %s124_s14 = scalar_lea.sflag (!%p118_p11), [#allocation5], %s596_s11 }
  0x4a   : > { %s308_s13 = smul.u32 (!%p118_p11), 24, %s596_s11 }
  0x4c   : > { %s127_s16 = scalar_lea.vmem (!%p118_p11), [#allocation4], %s308_s13 }
  0x50   : > { %439 = dma.done.wait (%p535_p9), %s124_s14, 384  }
  0x51   : > { %441 = vsyncadd (%p535_p9), %s124_s14, 4294966912  ;;  %s157_s7 = sld [smem:[#allocation3]]  ;;  %s291_s9 = sld [smem:[#allocation3 + $0x2]]  ;;  %v161_v0 = vld [vmem:[%s127_s16] sm:$0xff]  ;;  %v162_v3 = vld [vmem:[%s127_s16 + $0x8] sm:$0xff] }
  0x52   : > { %s290_s12 = sld [smem:[#allocation3 + $0x1]]  ;;  %s292_s15 = sld [smem:[#allocation3 + $0x3]]  ;;  %v163_v6 = vld [vmem:[%s127_s16 + $0x10] sm:$0xff] }
  0x53   : > { %s309_s17 = smul.u32 48, %s596_s11  ;;  %s187_s18 = scalar_lea.sflag [#allocation6], %s596_s11 }
  0x54   : > { %s194_s23 = smul.u32 (%p540_p12), 3, %s517_s0 }
  0x55   : > { %s145_s28 = scalar_lea.vmem [#allocation7], %s309_s17 }
  0x56   : > { %s195_s25 = ssub.s32 (%p540_p12), 5, %s194_s23 }
  0x57   : > { %v164_v1 = vstv %s157_s7  ;;  %v168_v2 = vstv %s291_s9  ;;  %p196_p9 = scmp.lt.s32.totalorder (%p540_p12), %s195_s25, 3 }
  0x58   : > { %v165_v4 = vmul.f32 %v164_v1, %v161_v0  ;;  %v166_v5 = vmul.f32 %v164_v1, %v162_v3  ;;  %v175_v7 = vstv %s290_s12  ;;  %v167_v8 = vmul.f32 %v164_v1, %v163_v6  ;;  %193 = sbr.rel (!%p540_p12) target bundleno = 123 (0x7b), region = 32 }
  0x59   : > { %v176_v9 = vmul.f32 %v175_v7, %v161_v0  ;;  %v179_v10 = vstv %s292_s15  ;;  %v177_v11 = vmul.f32 %v175_v7, %v162_v3  ;;  %v178_v14 = vmul.f32 %v175_v7, %v163_v6 }
  0x5a   : > { %v169_v12 = vadd.f32 %v168_v2, %v165_v4  ;;  %v170_v13 = vadd.f32 %v168_v2, %v166_v5  ;;  %v171_v15 = vadd.f32 %v168_v2, %v167_v8 }
  0x5b   : > { %v180_v16 = vadd.f32 %v179_v10, %v176_v9  ;;  %v181_v17 = vadd.f32 %v179_v10, %v177_v11  ;;  %v182_v18 = vadd.f32 %v179_v10, %v178_v14 }
  0x5c   : > { %172 = vst [vmem:[%s145_s28] sm:$0xff] %v169_v12  ;;  %173 = vst [vmem:[%s145_s28 + $0x10] sm:$0xff] %v170_v13 }
  0x5d   : > { %174 = vst [vmem:[%s145_s28 + $0x20] sm:$0xff] %v171_v15  ;;  %183 = vst [vmem:[%s145_s28 + $0x8] sm:$0xff] %v180_v16 }
  0x5e   : > { %184 = vst [vmem:[%s145_s28 + $0x18] sm:$0xff] %v181_v17  ;;  %185 = vst [vmem:[%s145_s28 + $0x28] sm:$0xff] %v182_v18 }
  0x5f   : > { %s683_s25 = smov (!%p196_p9, %s195_s25), 3 }
  0x60   : > { %s609_s26 = sshll.u32 %s683_s25, 8 }
  0x61   : > { %s201_s3 = ssub.s32 768, %s609_s26 }
  0x62   : > { %202 = vsyncadd %s187_s18, %s201_s3  ;;  %p295_p13 = scmp.ne.s32.totalorder %s609_s26, 0  ;;  %s306_s4 = smul.u32 768, %s517_s0 }
  0x63   : > { %s208_s29 = sshll.u32 %s145_s28, 4  ;;  %s466_s13 = smov [#allocation7]   ;;  %s621_s29 = int_to_ptr.vmem [resolvable:$true] %s208_s29 }
  0x64   : > { %s619_s8 = scalar_lea.hbm %s669_s2, %s306_s4  ;;  %s392_s10 = scalar_lea.vmem %s621_s29, %s609_s26 }
  0x65   : > { %p393_p12 = scmp.ne.s32.totalorder %s621_s29, %s392_s10  ;;  %s396_s14 = sshll.u32 %s466_s13, 4  ;;  %s397_s14 = int_to_ptr.vmem [resolvable:$false] %s396_s14 }
  0x66   : > { %s398_s0 = scalar_lea.vmem %s397_s14, 1536  ;;  %p399_p1 = scmp.lt.s32.totalorder %s621_s29, %s397_s14 }
  0x67   : > { %p394_p0 = pnand %p393_p12, %p295_p13  ;;  %p400_p3 = scmp.lt.s32.totalorder %s398_s0, %s392_s10 }
  0x69   : > { %p395_p2 = pneg %p394_p0  ;;  %p401_p4 = por %p400_p3, %p399_p1 }
  0x6b   : > { %p402_p6 = pnand %p401_p4, %p395_p2 }
  0x6d   : > { %405 = shalt.err (!%p402_p6)
}
  0x6e   : > { %s406_s16 = scalar_lea.hbm %s619_s8, %s609_s26  ;;  %s410_s12 = scalar_lea.hbm %s669_s2, 1280 }
  0x6f   : > { %p407_p7 = scmp.ne.s32.totalorder %s619_s8, %s406_s16  ;;  %p411_p10 = scmp.lt.u32.totalorder %s619_s8, %s669_s2 }
  0x70   : > { %p412_p11 = scmp.lt.u32.totalorder %s410_s12, %s406_s16  ;;  %p414_p12 = scmp.lt.u32.totalorder %s406_s16, %s619_s8 }
  0x71   : > { %p408_p8 = pnand %p407_p7, %p295_p13 }
  0x72   : > { %p413_p9 = por %p412_p11, %p411_p10 }
  0x73   : > { %p409_p5 = pneg %p408_p8 }
  0x74   : > { %p415_p0 = por %p414_p12, %p413_p9 }
  0x76   : > { %p416_p2 = pnand %p415_p0, %p409_p5 }
  0x78   : > { %419 = shalt.err (!%p416_p2)
}
  0x79   : > { %s467_s28 = smov 256   ;;  %s468_s23 = smov 16  }
  0x7a   : > { %214 = dma.vmem_to_hbm [thread:$0]  (%p295_p13), %s621_s29, %s609_s26, %s619_s8, %s187_s18, %s467_s28, %s467_s28, %s468_s23  }
  0x7b PF: > { %s223_s25 = sand.u32 1, %s448_s19   ;;  %p674_p1 = scmp.ne.s32.totalorder %s673_s30, 0 }
  0x7c   : > { %p675_p3 = scmp.ge.s32.totalorder %s460_s22, 2  ;;  %s224_s3 = scalar_lea.sflag [#allocation6], %s223_s25 }
  0x7e   : > { %p313_p4 = pnand %p675_p3, %p674_p1 }
  0x80   : > { %443 = dma.done.wait (!%p313_p4), %s224_s3, 768  }
  0x81   : > { %445 = vsyncadd (!%p313_p4), %s224_s3, 4294966528  ;;  %p19_p6 = scmp.ge.s32.totalorder %s521_s24, 4   ;;  %s676_s19 = smov %s452_s20 }
  0x82   : > { %s677_s20 = smov %s456_s21  ;;  %s678_s21 = smov %s533_s27 }
  0x83   : > { %s679_s22 = smov %s521_s24  ;;  %21 = sbr.rel (!%p19_p6) target bundleno = 17 (0x11), region = 69 }
  0x8a   :  { %229 = vsyncpa [#allocation5], 1 }
  0x8b   :  { %231 = vsyncpa [#allocation5 + $0x1], 1 }
  0x8c   :  { %232 = vsyncpa [#allocation6], 1 }
  0x8d   :  { %234 = vsyncpa [#allocation6 + $0x1], 1 }

</bundles_post_ra>
